<compile_context>
chip_gen: v5e
topology: v5e:2x2
jax: 0.10.0
libtpu: 0.0.40
codegen_flags: <defaults>
</compile_context>

<pallas_src>
import jax
import jax.numpy as jnp
from jax.experimental import pallas as pl
from jax.experimental.pallas import tpu as pltpu


def _se_gate_kernel(gate_ref, x_ref, o_ref):
    # gate_ref: (tile_c, 1), x_ref: (tile_c, HW), o_ref: (tile_c, HW)
    # Upcast in-register (free for f32, safe for bf16 on all generations),
    # compute, and cast back to the output dtype.
    g = jax.nn.sigmoid(gate_ref[...].astype(jnp.float32))
    x = x_ref[...].astype(jnp.float32)
    o_ref[...] = (g * x).astype(o_ref.dtype)   # broadcast over lane axis


def sigmoid_mul(x317, x313):
    """sigmoid(x317) * x313 with PyTorch broadcasting semantics.

    x317: (N, C, 1, 1), x313: (N, C, H, W)  -> (N, C, H, W)
    """
    N, C, H, W = x313.shape
    assert x317.shape == (N, C, 1, 1)
    NC = N * C
    HW = H * W

    out_dtype = jnp.result_type(x317.dtype, x313.dtype)

    # Keep native dtype in HBM — no wrapper casts.
    gate2d = x317.reshape(NC, 1)
    x2d = x313.reshape(NC, HW)

    # Pick a small channel-tile count (2-4) so Pallas can double-buffer the
    # HBM<->VMEM DMAs; each tile's channel count must stay a multiple of 8
    # (sublane constraint) unless it spans the full extent.
    num_tiles = 1
    for cand in (4, 3, 2):
        if NC % cand == 0 and (NC // cand) % 8 == 0:
            num_tiles = cand
            break
    tile_c = NC // num_tiles

    out2d = pl.pallas_call(
        _se_gate_kernel,
        out_shape=jax.ShapeDtypeStruct((NC, HW), out_dtype),
        grid=(num_tiles,),
        in_specs=[
            pl.BlockSpec((tile_c, 1), lambda i: (i, 0)),
            pl.BlockSpec((tile_c, HW), lambda i: (i, 0)),
        ],
        out_specs=pl.BlockSpec((tile_c, HW), lambda i: (i, 0)),
        compiler_params=pltpu.CompilerParams(
            # Channel tiles are independent -> parallel (dual-TC on v7x).
            dimension_semantics=("parallel",)
        ),
    )(gate2d, x2d)

    return out2d.reshape(N, C, H, W)


if __name__ == "__main__":
    key = jax.random.PRNGKey(0)
    k1, k2 = jax.random.split(key)

    # Shapes implied by the module's forward.
    x313 = jax.random.normal(k1, (1, 960, 14, 14), dtype=jnp.float32)
    x317 = jax.random.normal(k2, (1, 960, 1, 1), dtype=jnp.float32)

    out = sigmoid_mul(x317, x313)
    out = jax.block_until_ready(out)

    # Reference check in plain JAX.
    ref = jax.nn.sigmoid(x317) * x313
    assert out.shape == (1, 960, 14, 14)
    assert out.dtype == ref.dtype
    assert jnp.allclose(out, ref, atol=1e-6, rtol=1e-6)

    print("KERNEL_OK")
</pallas_src>

<mosaic_0001>
module attributes {stable_mosaic.version = 11 : i64} {
  func.func @_se_gate_kernel(%arg0: i32, %arg1: memref<240x1xf32, #tpu.memory_space<vmem>>, %arg2: memref<240x196xf32, #tpu.memory_space<vmem>>, %arg3: memref<240x196xf32, #tpu.memory_space<vmem>>) attributes {dimension_semantics = [#tpu.dimension_semantics<parallel>], iteration_bounds = array<i64: 4>, scalar_prefetch = 0 : i64, scratch_operands = 0 : i64, tpu.core_type = #tpu.core_type<tc>, window_params = [{transform_indices = @transform_0, window_bounds = array<i64: 240, 1>}, {transform_indices = @transform_1, window_bounds = array<i64: 240, 196>}, {transform_indices = @transform_2, window_bounds = array<i64: 240, 196>}]} {
    %c0 = arith.constant 0 : index
    %c0_0 = arith.constant 0 : index
    %0 = vector.load %arg1[%c0, %c0_0] : memref<240x1xf32, #tpu.memory_space<vmem>>, vector<240x1xf32>
    %1 = arith.negf %0 : vector<240x1xf32>
    %2 = math.exp %1 : vector<240x1xf32>
    %cst = arith.constant 1.000000e+00 : f32
    %3 = vector.broadcast %cst : f32 to vector<240x1xf32>
    %4 = arith.addf %3, %2 : vector<240x1xf32>
    %5 = arith.divf %3, %4 : vector<240x1xf32>
    %c0_1 = arith.constant 0 : index
    %c0_2 = arith.constant 0 : index
    %6 = vector.load %arg2[%c0_1, %c0_2] : memref<240x196xf32, #tpu.memory_space<vmem>>, vector<240x196xf32>
    %7 = vector.broadcast %5 : vector<240x1xf32> to vector<240x196xf32>
    %8 = arith.mulf %7, %6 : vector<240x196xf32>
    %c0_3 = arith.constant 0 : index
    %c0_4 = arith.constant 0 : index
    %9 = vector.load %arg3[%c0_3, %c0_4] : memref<240x196xf32, #tpu.memory_space<vmem>>, vector<240x196xf32>
    tpu.vector_store %arg3[%c0_3, %c0_4], %8 {strides = array<i32>} : memref<240x196xf32, #tpu.memory_space<vmem>>, vector<240x196xf32>,
    return
  }
  func.func @transform_0(%arg0: i32) -> (i32, i32) {
    %c0_i32 = arith.constant 0 : i32
    %c0_i32_0 = arith.constant 0 : i32
    return %arg0, %c0_i32 : i32, i32
  }
  func.func @transform_1(%arg0: i32) -> (i32, i32) {
    %c0_i32 = arith.constant 0 : i32
    %c0_i32_0 = arith.constant 0 : i32
    return %arg0, %c0_i32 : i32, i32
  }
  func.func @transform_2(%arg0: i32) -> (i32, i32) {
    %c0_i32 = arith.constant 0 : i32
    %c0_i32_0 = arith.constant 0 : i32
    return %arg0, %c0_i32 : i32, i32
  }
}

</mosaic_0001>

<bundles_post_ra>
// kernel: tpu_custom_call.1
= control target key start
LH: loop header
LB: loop body
LE: loop exit
PB: predicated region body
PF: predicated region fallthrough
CT: control target
= control target key end

     0   :  { %s1375_s9 = smov 0   ;;  %s2207_s0 = inlined_call_operand.vmem [shape: f32[960,1], index: 0, kind: input, shape index: {}]   ;;  %s2208_s1 = inlined_call_operand.vmem [shape: f32[960,196], index: 1, kind: input, shape index: {}]   ;;  %s2209_s2 = inlined_call_operand.vmem [shape: f32[960,196], index: 2, kind: output, shape index: {}]  }
   0x1 LB: > { %s1175_s10 = sadd.s32 4294967295, %s1357_s9   ;;  %p1179_p0 = scmp.ge.s32.totalorder %s1357_s9, 1  ;;  %s1357_s9 = sphi %s1375_s9, %s12_s9  }
   0x2   : > { %p125_p1 = scmp.lt.s32.totalorder %s1357_s9, 5 }
   0x4   : > { %p126_p2 = pnand %p1179_p0, %p125_p1 }
   0x5   : > { %s154_s11 = smul.u32 (!%p126_p2), 30, %s1175_s10 }
   0x6   : > { %129 = sbr.rel (%p126_p2) target bundleno = 270 (0x10e), region = 28 }
   0x7   : > { %p155_p3 = scmp.lt.s32.totalorder (!%p126_p2), %s154_s11, 119 }
   0xb   : > { %v1359_v0 = vmov 0   ;;  %s2323_s11 = smov (!%p155_p3, %s154_s11), 119 }
   0xc   : > { %1230 = vset.pattern.permute.xlu2 %v1359_v0  ;;  %1229 = vset.pattern.permute.xlu1 %v1359_v0  ;;  %s1180_s12 = sshll.u32 %s2323_s11, 3  ;;  %s1217_s16 = sshll.u32 %s2323_s11, 4 }
   0xd   : > { %1228 = vset.pattern.permute.xlu0 %v1359_v0  ;;  %s1389_s15 = scalar_lea.vmem %s2207_s0, %s1180_s12  ;;  %s1987_s19 = scalar_lea.vmem %s2208_s1, %s1217_s16 }
   0xe   : > { %v178_v1 = vld [vmem:[%s1389_s15 + $0x20] sm:$0xff]  ;;  %v176_v2 = vld [vmem:[%s1389_s15 + $0x10] sm:$0xff]  ;;  %v179_v7 = vld [vmem:[%s1389_s15 + $0x28] sm:$0xff]  ;;  %s2006_s22 = scalar_lea.vmem %s2209_s2, %s1217_s16 }
   0xf   : > { %v174_v3 = vld [vmem:[%s1389_s15] sm:$0xff]  ;;  %v1189_v4 = vmul.f32 -1.442695, %v178_v1  ;;  %v1187_v5 = vmul.f32 -1.442695, %v176_v2  ;;  %v177_v8 = vld [vmem:[%s1389_s15 + $0x18] sm:$0xff] }
  0x10   : > { %v1185_v6 = vmul.f32 -1.442695, %v174_v3  ;;  %v175_v9 = vld [vmem:[%s1389_s15 + $0x8] sm:$0xff]  ;;  %v1190_v10 = vmul.f32 -1.442695, %v179_v7  ;;  %v182_v13 = vld [vmem:[%s1389_s15 + $0x40] sm:$0xff] }
  0x11   : > { %1231 = vpow2.f32 %v1189_v4  ;;  %v1188_v11 = vmul.f32 -1.442695, %v177_v8  ;;  %v1186_v12 = vmul.f32 -1.442695, %v175_v9  ;;  %v181_v14 = vld [vmem:[%s1389_s15 + $0x38] sm:$0xff]  ;;  %v180_v17 = vld [vmem:[%s1389_s15 + $0x30] sm:$0xff] }
  0x12   : > { %1233 = vpow2.f32 %v1187_v5  ;;  %v1193_v15 = vmul.f32 -1.442695, %v182_v13  ;;  %v1192_v16 = vmul.f32 -1.442695, %v181_v14  ;;  %v1191_v23 = vmul.f32 -1.442695, %v180_v17 }
  0x13   : > { %1235 = vpow2.f32 %v1185_v6  ;;  %v185_v25 = vld [vmem:[%s1389_s15 + $0x58] sm:$0xff] }
  0x14   : > { %1237 = vpow2.f32 %v1190_v10  ;;  %v1417_v35 = vmul.f32 -1.442695, %v185_v25 }
  0x15   : > { %1239 = vpow2.f32 %v1188_v11 }
  0x16   : > { %1241 = vpow2.f32 %v1186_v12 }
  0x17   : > { %v1232_v18 = vpop.eup %1231  ;;  %1243 = vpow2.f32 %v1193_v15 }
  0x18   : > { %v1234_v19 = vpop.eup %1233  ;;  %v1400_v20 = vadd.f32 1.0, %v1232_v18  ;;  %1245 = vpow2.f32 %v1192_v16 }
  0x19   : > { %v1236_v21 = vpop.eup %1235  ;;  %v1402_v22 = vadd.f32 1.0, %v1234_v19 }
  0x1a   : > { %v1238_v24 = vpop.eup %1237  ;;  %1247 = vrcp.f32 %v1400_v20  ;;  %v393_v27 = vand.u32 2147483647, %v1400_v20  ;;  %v395_v28 = vand.u32 2147483648, %v1400_v20  ;;  %v1411_v32 = vadd.f32 1.0, %v1236_v21 }
  0x1b   : > { %v1240_v26 = vpop.eup %1239  ;;  %1249 = vrcp.f32 %v1402_v22  ;;  %v363_v30 = vand.u32 2147483647, %v1402_v22  ;;  %v365_v31 = vand.u32 2147483648, %v1402_v22  ;;  %v1413_v33 = vadd.f32 1.0, %v1238_v24 }
  0x1c   : > { %v1242_v29 = vpop.eup %1241  ;;  %v1415_v34 = vadd.f32 1.0, %v1240_v26  ;;  %1251 = vpow2.f32 %v1191_v23  ;;  %vm389_vm0 = vweird.f32 %v1400_v20  ;;  %vm359_vm1 = vweird.f32 %v1402_v22 }
  0x1d   : > { %v1244_v36 = vpop.eup %1243  ;;  %1253 = vrcp.f32 %v1411_v32  ;;  %v335_v37 = vand.u32 2147483648, %v1411_v32  ;;  %vm1423_vm2 = vcmp.eq.f32.partialorder %v393_v27, 8.507059e+37  ;;  %v396_v40 = vor.u32 1.1754944e-38, %v395_v28 }
  0x1e   : > { %v1246_v38 = vpop.eup %1245  ;;  %v333_v41 = vand.u32 2147483647, %v1411_v32  ;;  %1255 = vrcp.f32 %v1413_v33  ;;  %v1429_v42 = vadd.f32 1.0, %v1242_v29  ;;  %vm1431_vm3 = vcmp.eq.f32.partialorder %v363_v30, 8.507059e+37 }
  0x1f   : > { %v366_v45 = vor.u32 1.1754944e-38, %v365_v31  ;;  %v410_v46 = vand.u32 2147483648, %v1413_v33  ;;  %1257 = vrcp.f32 %v1415_v34  ;;  %vm329_vm4 = vweird.f32 %v1411_v32 }
  0x20   : > { %v1248_v43 = vpop.eup %1247  ;;  %vm404_vm5 = vweird.f32 %v1413_v33  ;;  %v408_v49 = vand.u32 2147483647, %v1413_v33  ;;  %v1442_v51 = vor.u32 1.1754944e-38, %v335_v37  ;;  %v378_v52 = vand.u32 2147483647, %v1415_v34 }
  0x21   : > { %v1250_v47 = vpop.eup %1249  ;;  %v385_v48 = vmul.f32 %v1248_v43, %v1400_v20  ;;  %v380_v53 = vand.u32 2147483648, %v1415_v34  ;;  %vm390_vm6 = vweird.f32 %v1248_v43  ;;  %vm1446_vm7 = vcmp.eq.f32.partialorder %v333_v41, 8.507059e+37 }
  0x22   : > { %v355_v50 = vmul.f32 %v1250_v47, %v1402_v22  ;;  %v1252_v54 = vpop.eup %1251  ;;  %vm374_vm8 = vweird.f32 %v1415_v34  ;;  %1259 = vrcp.f32 %v1429_v42  ;;  %vm360_vm9 = vweird.f32 %v1250_v47  ;;  %vm1462_vm12 = vmor %vm389_vm0, %vm390_vm6  ;;  %v189_v22 = vld [vmem:[%s1389_s15 + $0x78] sm:$0xff] }
  0x23   : > { %v386_v55 = vsub.f32 1.0, %v385_v48  ;;  %v1254_v57 = vpop.eup %1253  ;;  %v411_v59 = vor.u32 1.1754944e-38, %v410_v46  ;;  %vm344_vm10 = vweird.f32 %v1429_v42  ;;  %vm1454_vm11 = vcmp.eq.f32.partialorder %v408_v49, 8.507059e+37  ;;  %vm1475_vm15 = vmor %vm359_vm1, %vm360_vm9 }
  0x24   : > { %v356_v58 = vsub.f32 1.0, %v355_v50  ;;  %v1256_v60 = vpop.eup %1255  ;;  %v325_v62 = vmul.f32 %v1254_v57, %v1411_v32  ;;  %v381_v0 = vor.u32 1.1754944e-38, %v380_v53  ;;  %v348_v1 = vand.u32 2147483647, %v1429_v42 }
  0x25   : > { %v387_v61 = vmul.f32 %v1248_v43, %v386_v55  ;;  %v1258_v2 = vpop.eup %1257  ;;  %vm330_vm13 = vweird.f32 %v1254_v57  ;;  %v400_v5 = vmul.f32 %v1256_v60, %v1413_v33  ;;  %vm1467_vm14 = vcmp.eq.f32.partialorder %v378_v52, 8.507059e+37  ;;  %v184_v33 = vld [vmem:[%s1389_s15 + $0x50] sm:$0xff] }
  0x26   : > { %v357_v4 = vmul.f32 %v1250_v47, %v356_v58  ;;  %v350_v7 = vand.u32 2147483648, %v1429_v42  ;;  %v326_v10 = vsub.f32 1.0, %v325_v62  ;;  %vm405_vm0 = vweird.f32 %v1256_v60  ;;  %vm1493_vm1 = vmor %vm329_vm4, %vm330_vm13 }
  0x27   : > { %v388_v8 = vadd.f32 %v1248_v43, %v387_v61  ;;  %v370_v11 = vmul.f32 %v1258_v2, %v1415_v34  ;;  %v401_v13 = vsub.f32 1.0, %v400_v5  ;;  %vm375_vm6 = vweird.f32 %v1258_v2  ;;  %v186_v61 = vld [vmem:[%s1389_s15 + $0x60] sm:$0xff] }
  0x28   : > { %v358_v12 = vadd.f32 %v1250_v47, %v357_v4  ;;  %v1480_v14 = vadd.f32 1.0, %v1244_v36  ;;  %v1260_v15 = vpop.eup %1259  ;;  %v327_v17 = vmul.f32 %v1254_v57, %v326_v10  ;;  %v1484_v19 = vadd.f32 1.0, %v1246_v38  ;;  %vm1512_vm4 = vmor %vm374_vm8, %vm375_vm6 }
  0x29   : > { %v392_v16 = vsel %vm1462_vm12, %v1248_v43, %v388_v8  ;;  %v371_v18 = vsub.f32 1.0, %v370_v11  ;;  %v402_v23 = vmul.f32 %v1256_v60, %v401_v13  ;;  %v340_v24 = vmul.f32 %v1260_v15, %v1429_v42  ;;  %v188_v42 = vld [vmem:[%s1389_s15 + $0x70] sm:$0xff] }
  0x2a   : > { %v397_v20 = vsel %vm1423_vm2, %v396_v40, %v392_v16  ;;  %v362_v21 = vsel %vm1475_vm15, %v1250_v47, %v358_v12  ;;  %v328_v26 = vadd.f32 %v1254_v57, %v327_v17  ;;  %vm1503_vm2 = vmor %vm404_vm5, %vm405_vm0  ;;  %v1507_v29 = vadd.f32 1.0, %v1252_v54  ;;  %v183_v40 = vld [vmem:[%s1389_s15 + $0x48] sm:$0xff] }
  0x2b   : > { %856 = vperm.xlu2 %1230, %v397_v20   ;;  %v367_v25 = vsel %vm1431_vm3, %v366_v45, %v362_v21  ;;  %v372_v28 = vmul.f32 %v1258_v2, %v371_v18  ;;  %v403_v30 = vadd.f32 %v1256_v60, %v402_v23  ;;  %v341_v32 = vsub.f32 1.0, %v340_v24  ;;  %v190_v21 = vld [vmem:[%s1389_s15 + $0x80] sm:$0xff] }
  0x2c   : > { %846 = vperm.xlu1 %1229, %v367_v25   ;;  %vm345_vm3 = vweird.f32 %v1260_v15  ;;  %1261 = vrcp.f32 %v1480_v14  ;;  %v332_v36 = vsel %vm1493_vm1, %v1254_v57, %v328_v26  ;;  %v453_v38 = vand.u32 2147483647, %v1480_v14 }
  0x2d   : > { %v373_v37 = vadd.f32 %v1258_v2, %v372_v28  ;;  %v455_v39 = vand.u32 2147483648, %v1480_v14  ;;  %v337_v34 = vsel %vm1446_vm7, %v1442_v51, %v332_v36  ;;  %v407_v41 = vsel %vm1503_vm2, %v1256_v60, %v403_v30  ;;  %vm1533_vm5 = vmor %vm344_vm10, %vm345_vm3  ;;  %v187_v60 = vld [vmem:[%s1389_s15 + $0x68] sm:$0xff] }
  0x2e   : > { %v342_v43 = vmul.f32 %v1260_v15, %v341_v32  ;;  %1263 = vrcp.f32 %v1484_v19  ;;  %836 = vperm.xlu0 %1228, %v337_v34   ;;  %v1195_v46 = vmul.f32 -1.442695, %v184_v33  ;;  %v412_v47 = vsel %vm1454_vm11, %v411_v59, %v407_v41 }
  0x2f   : > { %v377_v44 = vsel %vm1512_vm4, %v1258_v2, %v373_v37  ;;  %v351_v49 = vor.u32 1.1754944e-38, %v350_v7  ;;  %v1194_v50 = vmul.f32 -1.442695, %v183_v40  ;;  %vm1541_vm7 = vcmp.eq.f32.partialorder %v348_v1, 8.507059e+37  ;;  %v191_v2 = vld [vmem:[%s1389_s15 + $0x88] sm:$0xff]  ;;  %v194_v37 = vld [vmem:[%s1389_s15 + $0xa0] sm:$0xff] }
  0x30   : > { %v343_v48 = vadd.f32 %v1260_v15, %v342_v43  ;;  %v382_v51 = vsel %vm1467_vm14, %v381_v0, %v377_v44  ;;  %vm449_vm8 = vweird.f32 %v1480_v14  ;;  %1265 = vrcp.f32 %v1507_v29  ;;  %v192_v43 = vld [vmem:[%s1389_s15 + $0x90] sm:$0xff] }
  0x31   : > { %vm1550_vm9 = vcmp.eq.f32.partialorder %v453_v38, 8.507059e+37  ;;  %v456_v56 = vor.u32 1.1754944e-38, %v455_v39  ;;  %1267 = vpow2.f32 %v1417_v35  ;;  %vm434_vm10 = vweird.f32 %v1484_v19  ;;  %v193_v38 = vld [vmem:[%s1389_s15 + $0x98] sm:$0xff] }
  0x32   : > { %v1262_v53 = vpop.eup %1261  ;;  %v347_v54 = vsel %vm1533_vm5, %v1260_v15, %v343_v48  ;;  %v438_v58 = vand.u32 2147483647, %v1484_v19  ;;  %v440_v59 = vand.u32 2147483648, %v1484_v19  ;;  %vm419_vm11 = vweird.f32 %v1507_v29 }
  0x33   : > { %861 = vperm.xlu2 %1230, %v412_v47   ;;  %v445_v57 = vmul.f32 %v1262_v53, %v1480_v14  ;;  %v352_v63 = vsel %vm1541_vm7, %v351_v49, %v347_v54  ;;  %1269 = vpow2.f32 %v1195_v46  ;;  %v1199_v35 = vmul.f32 -1.442695, %v188_v42 }
  0x34   : > { %v1264_v62 = vpop.eup %1263  ;;  %851 = vperm.xlu1 %1229, %v382_v51   ;;  %vm450_vm12 = vweird.f32 %v1262_v53  ;;  %1271 = vpow2.f32 %v1194_v50  ;;  %v423_v3 = vand.u32 2147483647, %v1507_v29  ;;  %v1198_v4 = vmul.f32 -1.442695, %v187_v60 }
  0x35   : > { %v446_v0 = vsub.f32 1.0, %v445_v57  ;;  %v430_v1 = vmul.f32 %v1264_v62, %v1484_v19  ;;  %1273 = vpow2.f32 %v1199_v35  ;;  %v1197_v5 = vmul.f32 -1.442695, %v186_v61  ;;  %vm1571_vm14 = vmor %vm449_vm8, %vm450_vm12 }
  0x36   : > { %v1266_v6 = vpop.eup %1265  ;;  %841 = vperm.xlu0 %1228, %v352_v63   ;;  %vm435_vm13 = vweird.f32 %v1264_v62  ;;  %v425_v9 = vand.u32 2147483648, %v1507_v29  ;;  %vm1575_vm15 = vcmp.eq.f32.partialorder %v438_v58, 8.507059e+37  ;;  %v441_v13 = vor.u32 1.1754944e-38, %v440_v59 }
  0x37   : > { %v447_v7 = vmul.f32 %v1262_v53, %v446_v0  ;;  %v431_v8 = vsub.f32 1.0, %v430_v1  ;;  %v1268_v10 = vpop.eup %1267  ;;  %v415_v15 = vmul.f32 %v1266_v6, %v1507_v29  ;;  %v1202_v16 = vmul.f32 -1.442695, %v191_v2  ;;  %vm1587_vm0 = vmor %vm434_vm10, %vm435_vm13 }
  0x38   : > { %v1580_v20 = vadd.f32 1.0, %v1268_v10  ;;  %1275 = vpow2.f32 %v1198_v4  ;;  %vm420_vm6 = vweird.f32 %v1266_v6  ;;  %vm1591_vm1 = vcmp.eq.f32.partialorder %v423_v3, 8.507059e+37 }
  0x39   : > { %v448_v17 = vadd.f32 %v1262_v53, %v447_v7  ;;  %v432_v18 = vmul.f32 %v1264_v62, %v431_v8  ;;  %v1270_v14 = vpop.eup %1269  ;;  %v416_v24 = vsub.f32 1.0, %v415_v15  ;;  %1277 = vpow2.f32 %v1197_v5  ;;  %vm1609_vm2 = vmor %vm419_vm11, %vm420_vm6 }
  0x3a   : > { %v1272_v26 = vpop.eup %1271  ;;  %v426_v19 = vor.u32 1.1754944e-38, %v425_v9  ;;  %1279 = vrcp.f32 %v1580_v20  ;;  %v1201_v33 = vmul.f32 -1.442695, %v190_v21  ;;  %v1600_v36 = vmul.f32 -1.442695, %v189_v22 }
  0x3b   : > { %v452_v27 = vsel %vm1571_vm14, %v1262_v53, %v448_v17  ;;  %v433_v28 = vadd.f32 %v1264_v62, %v432_v18  ;;  %v1274_v30 = vpop.eup %1273  ;;  %v417_v32 = vmul.f32 %v1266_v6, %v416_v24  ;;  %v1613_v34 = vadd.f32 1.0, %v1270_v14 }
  0x3c   : > { %v457_v31 = vsel %vm1550_vm9, %v456_v56, %v452_v27  ;;  %v1615_v41 = vadd.f32 1.0, %v1272_v26  ;;  %1281 = vpow2.f32 %v1202_v16  ;;  %v498_v46 = vand.u32 2147483647, %v1580_v20  ;;  %v197_v16 = vld [vmem:[%s1389_s15 + $0xb8] sm:$0xff] }
  0x3d   : > { %876 = vperm.xlu2 %1230, %v457_v31   ;;  %v437_v39 = vsel %vm1587_vm0, %v1264_v62, %v433_v28  ;;  %v418_v45 = vadd.f32 %v1266_v6, %v417_v32  ;;  %v1621_v47 = vadd.f32 1.0, %v1274_v30  ;;  %v500_v29 = vand.u32 2147483648, %v1580_v20 }
  0x3e   : > { %v442_v44 = vsel %vm1575_vm15, %v441_v13, %v437_v39  ;;  %v1276_v48 = vpop.eup %1275  ;;  %1283 = vrcp.f32 %v1613_v34  ;;  %v1625_v49 = vmul.f32 -1.442695, %v194_v37  ;;  %v1627_v50 = vmul.f32 -1.442695, %v193_v38 }
  0x3f   : > { %871 = vperm.xlu1 %1229, %v442_v44   ;;  %v1278_v51 = vpop.eup %1277  ;;  %v422_v52 = vsel %vm1609_vm2, %v1266_v6, %v418_v45  ;;  %v483_v42 = vand.u32 2147483647, %v1613_v34  ;;  %1285 = vrcp.f32 %v1615_v41  ;;  %v1633_v53 = vmul.f32 -1.442695, %v192_v43 }
  0x40   : > { %v1280_v54 = vpop.eup %1279  ;;  %v427_v55 = vsel %vm1591_vm1, %v426_v19, %v422_v52  ;;  %v485_v56 = vand.u32 2147483648, %v1613_v34  ;;  %v468_v57 = vand.u32 2147483647, %v1615_v41  ;;  %v470_v58 = vand.u32 2147483648, %v1615_v41 }
  0x41   : > { %866 = vperm.xlu0 %1228, %v427_v55   ;;  %v490_v59 = vmul.f32 %v1280_v54, %v1580_v20  ;;  %vm494_vm4 = vweird.f32 %v1580_v20  ;;  %vm1642_vm3 = vcmp.eq.f32.partialorder %v498_v46, 8.507059e+37  ;;  %1287 = vrcp.f32 %v1621_v47 }
  0x42   : > { %v1282_v61 = vpop.eup %1281  ;;  %v501_v62 = vor.u32 1.1754944e-38, %v500_v29  ;;  %vm479_vm5 = vweird.f32 %v1613_v34  ;;  %vm464_vm7 = vweird.f32 %v1615_v41  ;;  %v543_v63 = vand.u32 2147483647, %v1621_v47 }
  0x43   : > { %v491_v35 = vsub.f32 1.0, %v490_v59  ;;  %vm495_vm8 = vweird.f32 %v1280_v54  ;;  %vm1650_vm9 = vcmp.eq.f32.partialorder %v483_v42, 8.507059e+37  ;;  %v1654_v1 = vadd.f32 1.0, %v1276_v48 }
  0x44   : > { %v1656_v2 = vadd.f32 1.0, %v1278_v51  ;;  %v1284_v3 = vpop.eup %1283  ;;  %v486_v4 = vor.u32 1.1754944e-38, %v485_v56  ;;  %vm1658_vm10 = vcmp.eq.f32.partialorder %v468_v57, 8.507059e+37  ;;  %v471_v6 = vor.u32 1.1754944e-38, %v470_v58  ;;  %vm1668_vm12 = vmor %vm494_vm4, %vm495_vm8 }
  0x45   : > { %vm539_vm11 = vweird.f32 %v1621_v47  ;;  %v1286_v7 = vpop.eup %1285  ;;  %v492_v8 = vmul.f32 %v1280_v54, %v491_v35  ;;  %v475_v9 = vmul.f32 %v1284_v3, %v1613_v34  ;;  %v545_v10 = vand.u32 2147483648, %v1621_v47 }
  0x46   : > { %1289 = vrcp.f32 %v1654_v1  ;;  %v460_v12 = vmul.f32 %v1286_v7, %v1615_v41  ;;  %vm1673_vm13 = vcmp.eq.f32.partialorder %v543_v63, 8.507059e+37  ;;  %v1677_v15 = vadd.f32 1.0, %v1282_v61 }
  0x47   : > { %1291 = vpow2.f32 %v1201_v33  ;;  %v1288_v17 = vpop.eup %1287  ;;  %v493_v18 = vadd.f32 %v1280_v54, %v492_v8  ;;  %v476_v21 = vsub.f32 1.0, %v475_v9  ;;  %vm480_vm14 = vweird.f32 %v1284_v3  ;;  %v195_v9 = vld [vmem:[%s1389_s15 + $0xa8] sm:$0xff] }
  0x48   : > { %1293 = vrcp.f32 %v1656_v2  ;;  %v461_v20 = vsub.f32 1.0, %v460_v12  ;;  %vm465_vm15 = vweird.f32 %v1286_v7  ;;  %v535_v22 = vmul.f32 %v1288_v17, %v1621_v47  ;;  %vm1691_vm0 = vmor %vm479_vm5, %vm480_vm14 }
  0x49   : > { %v528_v14 = vand.u32 2147483647, %v1654_v1  ;;  %v497_v23 = vsel %vm1668_vm12, %v1280_v54, %v493_v18  ;;  %v477_v24 = vmul.f32 %v1284_v3, %v476_v21  ;;  %v546_v25 = vor.u32 1.1754944e-38, %v545_v10  ;;  %vm1698_vm1 = vmor %vm464_vm7, %vm465_vm15 }
  0x4a   : > { %v1685_v26 = vmul.f32 -1.442695, %v197_v16  ;;  %v502_v27 = vsel %vm1642_vm3, %v501_v62, %v497_v23  ;;  %v462_v19 = vmul.f32 %v1286_v7, %v461_v20  ;;  %v536_v30 = vsub.f32 1.0, %v535_v22 }
  0x4b   : > { %vm540_vm6 = vweird.f32 %v1288_v17  ;;  %891 = vperm.xlu2 %1230, %v502_v27   ;;  %v478_v32 = vadd.f32 %v1284_v3, %v477_v24  ;;  %vm524_vm2 = vweird.f32 %v1654_v1  ;;  %v530_v37 = vand.u32 2147483648, %v1654_v1 }
  0x4c   : > { %v1290_v31 = vpop.eup %1289  ;;  %1295 = vrcp.f32 %v1677_v15  ;;  %v463_v39 = vadd.f32 %v1286_v7, %v462_v19  ;;  %v537_v40 = vmul.f32 %v1288_v17, %v536_v30  ;;  %vm1706_vm4 = vcmp.eq.f32.partialorder %v528_v14, 8.507059e+37  ;;  %vm1715_vm3 = vmor %vm539_vm11, %vm540_vm6  ;;  %v199_v30 = vld [vmem:[%s1389_s15 + $0xc8] sm:$0xff] }
  0x4d   : > { %v1292_v38 = vpop.eup %1291  ;;  %v520_v34 = vmul.f32 %v1290_v31, %v1654_v1  ;;  %v482_v44 = vsel %vm1691_vm0, %v1284_v3, %v478_v32  ;;  %vm525_vm5 = vweird.f32 %v1290_v31  ;;  %v513_v46 = vand.u32 2147483647, %v1656_v2 }
  0x4e   : > { %v1294_v41 = vpop.eup %1293  ;;  %v515_v48 = vand.u32 2147483648, %v1656_v2  ;;  %v487_v29 = vsel %vm1650_vm9, %v486_v4, %v482_v44  ;;  %v467_v51 = vsel %vm1698_vm1, %v1286_v7, %v463_v39  ;;  %v538_v52 = vadd.f32 %v1288_v17, %v537_v40  ;;  %vm1739_vm9 = vmor %vm524_vm2, %vm525_vm5  ;;  %v196_v4 = vld [vmem:[%s1389_s15 + $0xb0] sm:$0xff] }
  0x4f   : > { %v521_v42 = vsub.f32 1.0, %v520_v34  ;;  %886 = vperm.xlu1 %1229, %v487_v29   ;;  %v472_v47 = vsel %vm1658_vm10, %v471_v6, %v467_v51  ;;  %v531_v54 = vor.u32 1.1754944e-38, %v530_v37  ;;  %v505_v55 = vmul.f32 %v1294_v41, %v1656_v2 }
  0x50   : > { %vm509_vm7 = vweird.f32 %v1656_v2  ;;  %881 = vperm.xlu0 %1228, %v472_v47   ;;  %v542_v56 = vsel %vm1715_vm3, %v1288_v17, %v538_v52  ;;  %vm584_vm8 = vweird.f32 %v1677_v15  ;;  %v1732_v58 = vadd.f32 1.0, %v1292_v38  ;;  %v200_v2 = vld [vmem:[%s1389_s15 + $0xd0] sm:$0xff]  ;;  %v198_v38 = vld [vmem:[%s1389_s15 + $0xc0] sm:$0xff] }
  0x51   : > { %v522_v57 = vmul.f32 %v1290_v31, %v521_v42  ;;  %v547_v60 = vsel %vm1673_vm13, %v546_v25, %v542_v56  ;;  %v506_v62 = vsub.f32 1.0, %v505_v55  ;;  %vm510_vm10 = vweird.f32 %v1294_v41 }
  0x52   : > { %v1296_v59 = vpop.eup %1295  ;;  %1297 = vpow2.f32 %v1600_v36  ;;  %vm1744_vm11 = vcmp.eq.f32.partialorder %v513_v46, 8.507059e+37  ;;  %v516_v0 = vor.u32 1.1754944e-38, %v515_v48  ;;  %v588_v5 = vand.u32 2147483647, %v1677_v15  ;;  %vm1757_vm12 = vmor %vm509_vm7, %vm510_vm10 }
  0x53   : > { %v523_v63 = vadd.f32 %v1290_v31, %v522_v57  ;;  %v580_v3 = vmul.f32 %v1296_v59, %v1677_v15  ;;  %906 = vperm.xlu2 %1230, %v547_v60   ;;  %v507_v1 = vmul.f32 %v1294_v41, %v506_v62  ;;  %v590_v6 = vand.u32 2147483648, %v1677_v15 }
  0x54   : > { %1299 = vrcp.f32 %v1732_v58  ;;  %vm585_vm13 = vweird.f32 %v1296_v59  ;;  %v1207_v12 = vmul.f32 -1.442695, %v196_v4  ;;  %vm1776_vm15 = vcmp.eq.f32.partialorder %v588_v5, 8.507059e+37 }
  0x55   : > { %v527_v36 = vsel %vm1739_vm9, %v1290_v31, %v523_v63  ;;  %v581_v8 = vsub.f32 1.0, %v580_v3  ;;  %1301 = vpow2.f32 %v1625_v49  ;;  %v508_v11 = vadd.f32 %v1294_v41, %v507_v1  ;;  %vm1772_vm14 = vmor %vm584_vm8, %vm585_vm13 }
  0x56   : > { %v532_v10 = vsel %vm1706_vm4, %v531_v54, %v527_v36  ;;  %1303 = vpow2.f32 %v1627_v50  ;;  %v591_v50 = vor.u32 1.1754944e-38, %v590_v6  ;;  %v1206_v21 = vmul.f32 -1.442695, %v195_v9 }
  0x57   : > { %v582_v13 = vmul.f32 %v1296_v59, %v581_v8  ;;  %1305 = vpow2.f32 %v1633_v53  ;;  %901 = vperm.xlu1 %1229, %v532_v10   ;;  %v512_v17 = vsel %vm1757_vm12, %v1294_v41, %v508_v11  ;;  %v1211_v14 = vmul.f32 -1.442695, %v200_v2 }
  0x58   : > { %v1298_v16 = vpop.eup %1297  ;;  %v517_v53 = vsel %vm1744_vm11, %v516_v0, %v512_v17  ;;  %1307 = vpow2.f32 %v1685_v26  ;;  %vm569_vm0 = vweird.f32 %v1732_v58  ;;  %v573_v26 = vand.u32 2147483647, %v1732_v58 }
  0x59   : > { %v583_v20 = vadd.f32 %v1296_v59, %v582_v13  ;;  %v1782_v22 = vadd.f32 1.0, %v1298_v16  ;;  %896 = vperm.xlu0 %1228, %v517_v53   ;;  %1309 = vpow2.f32 %v1207_v12  ;;  %v575_v19 = vand.u32 2147483648, %v1732_v58 }
  0x5a   : > { %v1300_v15 = vpop.eup %1299  ;;  %v1210_v44 = vmul.f32 -1.442695, %v199_v30  ;;  %vm1811_vm2 = vcmp.eq.f32.partialorder %v573_v26, 8.507059e+37  ;;  %v1816_v51 = vmul.f32 -1.442695, %v198_v38 }
  0x5b   : > { %v1302_v23 = vpop.eup %1301  ;;  %v587_v24 = vsel %vm1772_vm14, %v1296_v59, %v583_v20  ;;  %v565_v25 = vmul.f32 %v1300_v15, %v1732_v58  ;;  %1311 = vrcp.f32 %v1782_v22  ;;  %vm570_vm6 = vweird.f32 %v1300_v15 }
  0x5c   : > { %v1304_v27 = vpop.eup %1303  ;;  %v592_v28 = vsel %vm1776_vm15, %v591_v50, %v587_v24  ;;  %1313 = vpow2.f32 %v1206_v21  ;;  %v1795_v33 = vadd.f32 1.0, %v1302_v23  ;;  %v558_v39 = vand.u32 2147483647, %v1782_v22  ;;  %vm1807_vm1 = vmor %vm569_vm0, %vm570_vm6 }
  0x5d   : > { %v1306_v31 = vpop.eup %1305  ;;  %921 = vperm.xlu2 %1230, %v592_v28   ;;  %v566_v32 = vsub.f32 1.0, %v565_v25  ;;  %v1797_v37 = vadd.f32 1.0, %v1304_v27  ;;  %v560_v40 = vand.u32 2147483648, %v1782_v22  ;;  %1315 = vpow2.f32 %v1211_v14 }
  0x5e   : > { %v1802_v34 = vadd.f32 1.0, %v1306_v31  ;;  %v1308_v43 = vpop.eup %1307  ;;  %1317 = vrcp.f32 %v1795_v33  ;;  %v576_v29 = vor.u32 1.1754944e-38, %v575_v19  ;;  %vm554_vm4 = vweird.f32 %v1782_v22 }
  0x5f   : > { %v567_v41 = vmul.f32 %v1300_v15, %v566_v32  ;;  %v1310_v45 = vpop.eup %1309  ;;  %1319 = vrcp.f32 %v1797_v37  ;;  %v633_v47 = vand.u32 2147483647, %v1795_v33  ;;  %vm1822_vm3 = vcmp.eq.f32.partialorder %v558_v39, 8.507059e+37 }
  0x60   : > { %1321 = vrcp.f32 %v1802_v34  ;;  %v561_v57 = vor.u32 1.1754944e-38, %v560_v40  ;;  %v635_v58 = vand.u32 2147483648, %v1795_v33  ;;  %vm629_vm5 = vweird.f32 %v1795_v33 }
  0x61   : > { %v1312_v52 = vpop.eup %1311  ;;  %v568_v42 = vadd.f32 %v1300_v15, %v567_v41  ;;  %vm614_vm7 = vweird.f32 %v1797_v37  ;;  %1323 = vpow2.f32 %v1210_v44  ;;  %v1833_v63 = vadd.f32 1.0, %v1308_v43 }
  0x62   : > { %v1314_v54 = vpop.eup %1313  ;;  %v550_v55 = vmul.f32 %v1312_v52, %v1782_v22  ;;  %vm555_vm8 = vweird.f32 %v1312_v52  ;;  %vm1835_vm9 = vcmp.eq.f32.partialorder %v633_v47, 8.507059e+37  ;;  %v618_v3 = vand.u32 2147483647, %v1797_v37 }
  0x63   : > { %v572_v59 = vsel %vm1807_vm1, %v1300_v15, %v568_v42  ;;  %v1316_v60 = vpop.eup %1315  ;;  %v620_v4 = vand.u32 2147483648, %v1797_v37  ;;  %v1841_v1 = vadd.f32 1.0, %v1310_v45  ;;  %v636_v7 = vor.u32 1.1754944e-38, %v635_v58  ;;  %vm1847_vm11 = vmor %vm554_vm4, %vm555_vm8 }
  0x64   : > { %v577_v61 = vsel %vm1811_vm2, %v576_v29, %v572_v59  ;;  %v551_v62 = vsub.f32 1.0, %v550_v55  ;;  %v1318_v35 = vpop.eup %1317  ;;  %vm599_vm10 = vweird.f32 %v1802_v34  ;;  %v603_v11 = vand.u32 2147483647, %v1802_v34 }
  0x65   : > { %916 = vperm.xlu1 %1229, %v577_v61   ;;  %v1320_v5 = vpop.eup %1319  ;;  %v625_v36 = vmul.f32 %v1318_v35, %v1795_v33  ;;  %v605_v12 = vand.u32 2147483648, %v1802_v34  ;;  %1325 = vrcp.f32 %v1833_v63  ;;  %vm630_vm12 = vweird.f32 %v1318_v35 }
  0x66   : > { %v552_v6 = vmul.f32 %v1312_v52, %v551_v62  ;;  %v1322_v8 = vpop.eup %1321  ;;  %v610_v10 = vmul.f32 %v1320_v5, %v1797_v37  ;;  %vm615_vm13 = vweird.f32 %v1320_v5  ;;  %1327 = vrcp.f32 %v1841_v1  ;;  %vm1865_vm15 = vmor %vm629_vm5, %vm630_vm12 }
  0x67   : > { %v626_v2 = vsub.f32 1.0, %v625_v36  ;;  %v595_v16 = vmul.f32 %v1322_v8, %v1802_v34  ;;  %v1324_v17 = vpop.eup %1323  ;;  %v1857_v18 = vadd.f32 1.0, %v1314_v54  ;;  %vm600_vm14 = vweird.f32 %v1322_v8  ;;  %vm1875_vm6 = vmor %vm614_vm7, %vm615_vm13 }
  0x68   : > { %v553_v13 = vadd.f32 %v1312_v52, %v552_v6  ;;  %v611_v49 = vsub.f32 1.0, %v610_v10  ;;  %vm1869_vm0 = vcmp.eq.f32.partialorder %v618_v3, 8.507059e+37  ;;  %v621_v23 = vor.u32 1.1754944e-38, %v620_v4  ;;  %vm1887_vm2 = vmor %vm599_vm10, %vm600_vm14  ;;  %v202_v6 = vld [vmem:[%s1389_s15 + $0xe0] sm:$0xff]  ;;  %v201_v10 = vld [vmem:[%s1389_s15 + $0xd8] sm:$0xff] }
  0x69   : > { %v627_v21 = vmul.f32 %v1318_v35, %v626_v2  ;;  %v596_v53 = vsub.f32 1.0, %v595_v16  ;;  %vm1879_vm1 = vcmp.eq.f32.partialorder %v603_v11, 8.507059e+37  ;;  %v1883_v26 = vadd.f32 1.0, %v1316_v60 }
  0x6a   : > { %v557_v50 = vsel %vm1847_vm11, %v1312_v52, %v553_v13  ;;  %v612_v15 = vmul.f32 %v1320_v5, %v611_v49  ;;  %v606_v32 = vor.u32 1.1754944e-38, %v605_v12  ;;  %vm674_vm4 = vweird.f32 %v1833_v63 }
  0x6b   : > { %v562_v20 = vsel %vm1822_vm3, %v561_v57, %v557_v50  ;;  %v628_v24 = vadd.f32 %v1318_v35, %v627_v21  ;;  %v597_v27 = vmul.f32 %v1322_v8, %v596_v53  ;;  %v1326_v19 = vpop.eup %1325  ;;  %1329 = vrcp.f32 %v1857_v18 }
  0x6c   : > { %911 = vperm.xlu0 %1228, %v562_v20   ;;  %v613_v30 = vadd.f32 %v1320_v5, %v612_v15  ;;  %v670_v38 = vmul.f32 %v1326_v19, %v1833_v63  ;;  %v678_v39 = vand.u32 2147483647, %v1833_v63  ;;  %v1328_v40 = vpop.eup %1327  ;;  %vm675_vm3 = vweird.f32 %v1326_v19 }
  0x6d   : > { %v632_v33 = vsel %vm1865_vm15, %v1318_v35, %v628_v24  ;;  %v598_v37 = vadd.f32 %v1322_v8, %v597_v27  ;;  %v680_v41 = vand.u32 2147483648, %v1833_v63  ;;  %v655_v48 = vmul.f32 %v1328_v40, %v1841_v1  ;;  %vm1916_vm8 = vmor %vm674_vm4, %vm675_vm3  ;;  %v203_v35 = vld [vmem:[%s1389_s15 + $0xe8] sm:$0xff] }
  0x6e   : > { %v637_v34 = vsel %vm1835_vm9, %v636_v7, %v632_v33  ;;  %v617_v43 = vsel %vm1875_vm6, %v1320_v5, %v613_v30  ;;  %v671_v46 = vsub.f32 1.0, %v670_v38  ;;  %vm659_vm5 = vweird.f32 %v1841_v1 }
  0x6f   : > { %936 = vperm.xlu2 %1230, %v637_v34   ;;  %v622_v44 = vsel %vm1869_vm0, %v621_v23, %v617_v43  ;;  %v602_v45 = vsel %vm1887_vm2, %v1322_v8, %v598_v37  ;;  %v663_v52 = vand.u32 2147483647, %v1841_v1  ;;  %v665_v42 = vand.u32 2147483648, %v1841_v1  ;;  %v790_v34 = vld [vmem:[%s1987_s19 + $0x80] sm:$0xff] }
  0x70   : > { %931 = vperm.xlu1 %1229, %v622_v44   ;;  %v607_v29 = vsel %vm1879_vm1, %v606_v32, %v602_v45  ;;  %v672_v47 = vmul.f32 %v1326_v19, %v671_v46  ;;  %v656_v54 = vsub.f32 1.0, %v655_v48  ;;  %vm660_vm7 = vweird.f32 %v1328_v40 }
  0x71   : > { %1331 = vrcp.f32 %v1883_v26  ;;  %v1330_v55 = vpop.eup %1329  ;;  %vm1920_vm9 = vcmp.eq.f32.partialorder %v678_v39, 8.507059e+37  ;;  %v681_v58 = vor.u32 1.1754944e-38, %v680_v41  ;;  %vm644_vm10 = vweird.f32 %v1857_v18  ;;  %vm1932_vm11 = vmor %vm659_vm5, %vm660_vm7 }
  0x72   : > { %v1925_v59 = vadd.f32 1.0, %v1324_v17  ;;  %v673_v60 = vadd.f32 %v1326_v19, %v672_v47  ;;  %v657_v61 = vmul.f32 %v1328_v40, %v656_v54  ;;  %v640_v62 = vmul.f32 %v1330_v55, %v1857_v18 }
  0x73   : > { %v648_v63 = vand.u32 2147483647, %v1857_v18  ;;  %vm1936_vm12 = vcmp.eq.f32.partialorder %v663_v52, 8.507059e+37  ;;  %v666_v4 = vor.u32 1.1754944e-38, %v665_v42  ;;  %v650_v5 = vand.u32 2147483648, %v1857_v18  ;;  %v783_v52 = vld [vmem:[%s1987_s19 + $0x48] sm:$0xff] }
  0x74   : > { %926 = vperm.xlu0 %1228, %v607_v29   ;;  %1333 = vrcp.f32 %v1925_v59  ;;  %v677_v36 = vsel %vm1916_vm8, %v1326_v19, %v673_v60  ;;  %v658_v7 = vadd.f32 %v1328_v40, %v657_v61  ;;  %v641_v8 = vsub.f32 1.0, %v640_v62  ;;  %v782_v29 = vld [vmem:[%s1987_s19 + $0x40] sm:$0xff] }
  0x75   : > { %vm645_vm13 = vweird.f32 %v1330_v55  ;;  %v682_v1 = vsel %vm1920_vm9, %v681_v58, %v677_v36  ;;  %1335 = vpow2.f32 %v1816_v51  ;;  %v1214_v9 = vmul.f32 -1.442695, %v203_v35 }
  0x76   : > { %v662_v12 = vsel %vm1932_vm11, %v1328_v40, %v658_v7  ;;  %v642_v13 = vmul.f32 %v1330_v55, %v641_v8  ;;  %v725_v2 = vand.u32 2147483648, %v1883_v26  ;;  %v1213_v16 = vmul.f32 -1.442695, %v202_v6  ;;  %vm1956_vm14 = vmor %vm644_vm10, %vm645_vm13 }
  0x77   : > { %v1332_v11 = vpop.eup %1331  ;;  %951 = vperm.xlu2 %1230, %v682_v1   ;;  %v667_v17 = vsel %vm1936_vm12, %v666_v4, %v662_v12  ;;  %vm1960_vm15 = vcmp.eq.f32.partialorder %v648_v63, 8.507059e+37  ;;  %v651_v50 = vor.u32 1.1754944e-38, %v650_v5  ;;  %vm719_vm0 = vweird.f32 %v1883_v26 }
  0x78   : > { %v715_v21 = vmul.f32 %v1332_v11, %v1883_v26  ;;  %946 = vperm.xlu1 %1229, %v667_v17   ;;  %v643_v53 = vadd.f32 %v1330_v55, %v642_v13  ;;  %1337 = vpow2.f32 %v1214_v9  ;;  %v1212_v20 = vmul.f32 -1.442695, %v201_v10  ;;  %v784_v9 = vld [vmem:[%s1987_s19 + $0x50] sm:$0xff]  ;;  %v785_v10 = vld [vmem:[%s1987_s19 + $0x58] sm:$0xff] }
  0x79   : > { %vm720_vm6 = vweird.f32 %v1332_v11  ;;  %v723_v15 = vand.u32 2147483647, %v1883_v26  ;;  %1339 = vpow2.f32 %v1213_v16  ;;  %v726_v23 = vor.u32 1.1754944e-38, %v725_v2 }
  0x7a   : > { %v1334_v22 = vpop.eup %1333  ;;  %v716_v18 = vsub.f32 1.0, %v715_v21  ;;  %v647_v14 = vsel %vm1956_vm14, %v1330_v55, %v643_v53  ;;  %vm704_vm1 = vweird.f32 %v1925_v59  ;;  %v710_v19 = vand.u32 2147483648, %v1925_v59  ;;  %vm1977_vm2 = vmor %vm719_vm0, %vm720_vm6  ;;  %v786_v21 = vld [vmem:[%s1987_s19 + $0x60] sm:$0xff] }
  0x7b   : > { %v700_v24 = vmul.f32 %v1334_v22, %v1925_v59  ;;  %v1336_v25 = vpop.eup %1335  ;;  %v652_v27 = vsel %vm1960_vm15, %v651_v50, %v647_v14  ;;  %1341 = vpow2.f32 %v1212_v20  ;;  %vm705_vm4 = vweird.f32 %v1334_v22 }
  0x7c   : > { %v717_v28 = vmul.f32 %v1332_v11, %v716_v18  ;;  %941 = vperm.xlu0 %1228, %v652_v27   ;;  %v708_v32 = vand.u32 2147483647, %v1925_v59  ;;  %v318_v33 = vadd.f32 1.0, %v1336_v25  ;;  %vm724_vm3 = vcmp.eq.f32.partialorder %v723_v15, 8.507059e+37  ;;  %vm1993_vm5 = vmor %vm704_vm1, %vm705_vm4  ;;  %v809_v18 = vld [vmem:[%s1987_s19 + $0x118] sm:$0xff]  ;;  %v794_v27 = vld [vmem:[%s1987_s19 + $0xa0] sm:$0xff] }
  0x7d   : > { %v701_v31 = vsub.f32 1.0, %v700_v24  ;;  %v711_v43 = vor.u32 1.1754944e-38, %v710_v19  ;;  %vm1045_vm8 = vcmask 556032  }
  0x7e   : > { %v718_v37 = vadd.f32 %v1332_v11, %v717_v28  ;;  %v1338_v38 = vpop.eup %1337  ;;  %1343 = vrcp.f32 %v318_v33  ;;  %vm709_vm7 = vcmp.eq.f32.partialorder %v708_v32, 8.507059e+37  ;;  %v693_v54 = vand.u32 2147483647, %v318_v33 }
  0x7f   : > { %v702_v26 = vmul.f32 %v1334_v22, %v701_v31  ;;  %v1340_v39 = vpop.eup %1339  ;;  %v323_v41 = vadd.f32 1.0, %v1338_v38  ;;  %v695_v57 = vand.u32 2147483648, %v318_v33  ;;  %vm689_vm9 = vweird.f32 %v318_v33 }
  0x80   : > { %v722_v40 = vsel %vm1977_vm2, %v1332_v11, %v718_v37  ;;  %v322_v46 = vadd.f32 1.0, %v1340_v39  ;;  %vm2014_vm11 = vcmp.eq.f32.partialorder %v693_v54, 8.507059e+37  ;;  %v803_v11 = vld [vmem:[%s1987_s19 + $0xe8] sm:$0xff] }
  0x81   : > { %v727_v44 = vsel %vm724_vm3, %v726_v23, %v722_v40  ;;  %v703_v45 = vadd.f32 %v1334_v22, %v702_v26  ;;  %v1342_v48 = vpop.eup %1341  ;;  %1345 = vrcp.f32 %v323_v41  ;;  %v768_v62 = vand.u32 2147483647, %v323_v41 }
  0x82   : > { %966 = vperm.xlu2 %1230, %v727_v44   ;;  %1347 = vrcp.f32 %v322_v46  ;;  %v2008_v58 = vadd.f32 1.0, %v1342_v48  ;;  %v770_v0 = vand.u32 2147483648, %v323_v41  ;;  %v696_v5 = vor.u32 1.1754944e-38, %v695_v57 }
  0x83   : > { %v707_v42 = vsel %vm1993_vm5, %v1334_v22, %v703_v45  ;;  %v753_v36 = vand.u32 2147483647, %v322_v46  ;;  %vm764_vm12 = vweird.f32 %v323_v41  ;;  %v755_v1 = vand.u32 2147483648, %v322_v46 }
  0x84   : > { %v712_v47 = vsel %vm709_vm7, %v711_v43, %v707_v42  ;;  %v1344_v56 = vpop.eup %1343  ;;  %1349 = vrcp.f32 %v2008_v58  ;;  %vm2025_vm15 = vcmp.eq.f32.partialorder %v768_v62, 8.507059e+37  ;;  %vm749_vm0 = vweird.f32 %v322_v46  ;;  %v791_v43 = vld [vmem:[%s1987_s19 + $0x88] sm:$0xff]  ;;  %v780_v62 = vld [vmem:[%s1987_s19 + $0x30] sm:$0xff] }
  0x85   : > { %v857_v55 = vpop.permute.xlu2 %856  ;;  %961 = vperm.xlu1 %1229, %v712_v47   ;;  %v685_v61 = vmul.f32 %v1344_v56, %v318_v33  ;;  %vm690_vm10 = vweird.f32 %v1344_v56  ;;  %v771_v16 = vor.u32 1.1754944e-38, %v770_v0  ;;  %vm2029_vm1 = vcmp.eq.f32.partialorder %v753_v36, 8.507059e+37  ;;  %v777_v36 = vld [vmem:[%s1987_s19 + $0x18] sm:$0xff] }
  0x86   : > { %v992_v59 = vmul.f32 %v857_v55, %v782_v29  ;;  %v993_v60 = vmul.f32 %v857_v55, %v783_v52  ;;  %vm2021_vm13 = vmor %vm689_vm9, %vm690_vm10  ;;  %v756_v14 = vor.u32 1.1754944e-38, %v755_v1  ;;  %vm734_vm3 = vweird.f32 %v2008_v58  ;;  %v778_v29 = vld [vmem:[%s1987_s19 + $0x20] sm:$0xff]  ;;  %v779_v52 = vld [vmem:[%s1987_s19 + $0x28] sm:$0xff] }
  0x87   : > { %v1346_v63 = vpop.eup %1345  ;;  %v686_v35 = vsub.f32 1.0, %v685_v61  ;;  %v740_v28 = vand.u32 2147483648, %v2008_v58  ;;  %v738_v31 = vand.u32 2147483647, %v2008_v58  ;;  %v774_v55 = vld [vmem:[%s1987_s19] sm:$0xff]  ;;  %v797_v61 = vld [vmem:[%s1987_s19 + $0xb8] sm:$0xff] }
  0x88   : > { %1053 = vst [vmem:[%s2006_s22 + $0x40] sm:$0xff] %v992_v59  ;;  %v1348_v3 = vpop.eup %1347  ;;  %v760_v6 = vmul.f32 %v1346_v63, %v323_v41  ;;  %vm765_vm14 = vweird.f32 %v1346_v63 }
  0x89   : > { %1054 = vst.msk [vmem:[%s2006_s22 + $0x48] sm:$0xff] %vm1045_vm8, %v993_v60  ;;  %v687_v7 = vmul.f32 %v1344_v56, %v686_v35  ;;  %v745_v8 = vmul.f32 %v1348_v3, %v322_v46  ;;  %vm750_vm6 = vweird.f32 %v1348_v3  ;;  %vm2036_vm2 = vmor %vm764_vm12, %vm765_vm14  ;;  %v741_v39 = vor.u32 1.1754944e-38, %v740_v28  ;;  %v796_v60 = vld [vmem:[%s1987_s19 + $0xb0] sm:$0xff]  ;;  %v795_v28 = vld [vmem:[%s1987_s19 + $0xa8] sm:$0xff] }
  0x8a   : > { %v761_v12 = vsub.f32 1.0, %v760_v6  ;;  %v1350_v51 = vpop.eup %1349  ;;  %vm2044_vm4 = vmor %vm749_vm0, %vm750_vm6  ;;  %vm739_vm9 = vcmp.eq.f32.partialorder %v738_v31, 8.507059e+37  ;;  %v776_v6 = vld [vmem:[%s1987_s19 + $0x10] sm:$0xff] }
  0x8b   : > { %v688_v2 = vadd.f32 %v1344_v56, %v687_v7  ;;  %v746_v17 = vsub.f32 1.0, %v745_v8  ;;  %v730_v23 = vmul.f32 %v1350_v51, %v2008_v58  ;;  %vm735_vm5 = vweird.f32 %v1350_v51 }
  0x8c   : > { %v762_v50 = vmul.f32 %v1346_v63, %v761_v12  ;;  %vm736_vm7 = vmor %vm734_vm3, %vm735_vm5 }
  0x8d   : > { %v862_v49 = vpop.permute.xlu2 %861  ;;  %v692_v22 = vsel %vm2021_vm13, %v1344_v56, %v688_v2  ;;  %v747_v15 = vmul.f32 %v1348_v3, %v746_v17  ;;  %v731_v30 = vsub.f32 1.0, %v730_v23  ;;  %v775_v56 = vld [vmem:[%s1987_s19 + $0x8] sm:$0xff]  ;;  %v789_v17 = vld [vmem:[%s1987_s19 + $0x78] sm:$0xff] }
  0x8e   : > { %v994_v53 = vmul.f32 %v862_v49, %v784_v9  ;;  %v995_v20 = vmul.f32 %v862_v49, %v785_v10  ;;  %v697_v24 = vsel %vm2014_vm11, %v696_v5, %v692_v22  ;;  %v763_v25 = vadd.f32 %v1346_v63, %v762_v50  ;;  %v802_v10 = vld [vmem:[%s1987_s19 + $0xe0] sm:$0xff]  ;;  %v808_v22 = vld [vmem:[%s1987_s19 + $0x110] sm:$0xff] }
  0x8f   : > { %956 = vperm.xlu0 %1228, %v697_v24   ;;  %v748_v19 = vadd.f32 %v1348_v3, %v747_v15  ;;  %v732_v38 = vmul.f32 %v1350_v51, %v731_v30  ;;  %v793_v30 = vld [vmem:[%s1987_s19 + $0x98] sm:$0xff] }
  0x90   : > { %1055 = vst [vmem:[%s2006_s22 + $0x50] sm:$0xff] %v994_v53  ;;  %v767_v32 = vsel %vm2036_vm2, %v1346_v63, %v763_v25  ;;  %v781_v63 = vld [vmem:[%s1987_s19 + $0x38] sm:$0xff]  ;;  %v787_v53 = vld [vmem:[%s1987_s19 + $0x68] sm:$0xff] }
  0x91   : > { %1056 = vst.msk [vmem:[%s2006_s22 + $0x58] sm:$0xff] %vm1045_vm8, %v995_v20  ;;  %v772_v33 = vsel %vm2025_vm15, %v771_v16, %v767_v32  ;;  %v752_v37 = vsel %vm2044_vm4, %v1348_v3, %v748_v19  ;;  %v733_v40 = vadd.f32 %v1350_v51, %v732_v38  ;;  %v788_v16 = vld [vmem:[%s1987_s19 + $0x70] sm:$0xff] }
  0x92   : > { %981 = vperm.xlu2 %1230, %v772_v33   ;;  %v757_v26 = vsel %vm2029_vm1, %v756_v14, %v752_v37  ;;  %v792_v19 = vld [vmem:[%s1987_s19 + $0x90] sm:$0xff] }
  0x93   : > { %976 = vperm.xlu1 %1229, %v757_v26   ;;  %v737_v41 = vsel %vm736_vm7, %v1350_v51, %v733_v40  ;;  %v815_v40 = vld [vmem:[%s1987_s19 + $0x148] sm:$0xff] }
  0x94   : > { %v742_v45 = vsel %vm739_vm9, %v741_v39, %v737_v41  ;;  %v814_v39 = vld [vmem:[%s1987_s19 + $0x140] sm:$0xff] }
  0x97   : > { %v877_v44 = vpop.permute.xlu2 %876  ;;  %971 = vperm.xlu0 %1228, %v742_v45   ;;  %v798_v45 = vld [vmem:[%s1987_s19 + $0xc0] sm:$0xff] }
  0x98   : > { %v1000_v46 = vmul.f32 %v877_v44, %v790_v34  ;;  %v1001_v48 = vmul.f32 %v877_v44, %v791_v43  ;;  %v800_v34 = vld [vmem:[%s1987_s19 + $0xd0] sm:$0xff]  ;;  %v801_v43 = vld [vmem:[%s1987_s19 + $0xd8] sm:$0xff] }
  0x9a   : > { %1061 = vst [vmem:[%s2006_s22 + $0x80] sm:$0xff] %v1000_v46 }
  0x9b   : > { %1062 = vst.msk [vmem:[%s2006_s22 + $0x88] sm:$0xff] %vm1045_vm8, %v1001_v48 }
  0x9e   : > { %v847_v42 = vpop.permute.xlu1 %846 }
  0x9f   : > { %v988_v47 = vmul.f32 %v847_v42, %v778_v29  ;;  %v989_v54 = vmul.f32 %v847_v42, %v779_v52  ;;  %v799_v52 = vld [vmem:[%s1987_s19 + $0xc8] sm:$0xff] }
  0xa0   : > { %v837_v57 = vpop.permute.xlu0 %836 }
  0xa1   : > { %1049 = vst [vmem:[%s2006_s22 + $0x20] sm:$0xff] %v988_v47  ;;  %v984_v58 = vmul.f32 %v837_v57, %v774_v55  ;;  %v985_v59 = vmul.f32 %v837_v57, %v775_v56  ;;  %v820_v56 = vld [vmem:[%s1987_s19 + $0x170] sm:$0xff]  ;;  %v821_v57 = vld [vmem:[%s1987_s19 + $0x178] sm:$0xff] }
  0xa2   : > { %1050 = vst.msk [vmem:[%s2006_s22 + $0x28] sm:$0xff] %vm1045_vm8, %v989_v54 }
  0xa3   : > { %1044 = vst [vmem:[%s2006_s22] sm:$0xff] %v984_v58 }
  0xa4   : > { %1046 = vst.msk [vmem:[%s2006_s22 + $0x8] sm:$0xff] %vm1045_vm8, %v985_v59 }
  0xa5   : > { %v892_v35 = vpop.permute.xlu2 %891 }
  0xa6   : > { %v852_v0 = vpop.permute.xlu1 %851  ;;  %v1006_v3 = vmul.f32 %v892_v35, %v796_v60  ;;  %v1007_v4 = vmul.f32 %v892_v35, %v797_v61  ;;  %v806_v61 = vld [vmem:[%s1987_s19 + $0x100] sm:$0xff] }
  0xa7   : > { %v990_v5 = vmul.f32 %v852_v0, %v780_v62  ;;  %v991_v7 = vmul.f32 %v852_v0, %v781_v63  ;;  %v807_v62 = vld [vmem:[%s1987_s19 + $0x108] sm:$0xff] }
  0xa8   : > { %1067 = vst [vmem:[%s2006_s22 + $0xb0] sm:$0xff] %v1006_v3  ;;  %v842_v8 = vpop.permute.xlu0 %841  ;;  %v826_v3 = vld [vmem:[%s1987_s19 + $0x1a0] sm:$0xff] }
  0xa9   : > { %1068 = vst.msk [vmem:[%s2006_s22 + $0xb8] sm:$0xff] %vm1045_vm8, %v1007_v4  ;;  %v986_v1 = vmul.f32 %v842_v8, %v776_v6  ;;  %v987_v9 = vmul.f32 %v842_v8, %v777_v36  ;;  %v827_v4 = vld [vmem:[%s1987_s19 + $0x1a8] sm:$0xff]  ;;  %v805_v6 = vld [vmem:[%s1987_s19 + $0xf8] sm:$0xff] }
  0xaa   : > { %1051 = vst [vmem:[%s2006_s22 + $0x30] sm:$0xff] %v990_v5  ;;  %v804_v5 = vld [vmem:[%s1987_s19 + $0xf0] sm:$0xff] }
  0xab   : > { %1052 = vst.msk [vmem:[%s2006_s22 + $0x38] sm:$0xff] %vm1045_vm8, %v991_v7 }
  0xac   : > { %1047 = vst [vmem:[%s2006_s22 + $0x10] sm:$0xff] %v986_v1 }
  0xad   : > { %v907_v12 = vpop.permute.xlu2 %906  ;;  %1048 = vst.msk [vmem:[%s2006_s22 + $0x18] sm:$0xff] %vm1045_vm8, %v987_v9 }
  0xae   : > { %v1012_v13 = vmul.f32 %v907_v12, %v802_v10  ;;  %v1013_v2 = vmul.f32 %v907_v12, %v803_v11  ;;  %v812_v11 = vld [vmem:[%s1987_s19 + $0x130] sm:$0xff]  ;;  %v813_v12 = vld [vmem:[%s1987_s19 + $0x138] sm:$0xff] }
  0xb0   : > { %1073 = vst [vmem:[%s2006_s22 + $0xe0] sm:$0xff] %v1012_v13 }
  0xb1   : > { %v872_v49 = vpop.permute.xlu1 %871  ;;  %1074 = vst.msk [vmem:[%s2006_s22 + $0xe8] sm:$0xff] %vm1045_vm8, %v1013_v2 }
  0xb2   : > { %v998_v51 = vmul.f32 %v872_v49, %v788_v16  ;;  %v999_v50 = vmul.f32 %v872_v49, %v789_v17  ;;  %v810_v17 = vld [vmem:[%s1987_s19 + $0x120] sm:$0xff]  ;;  %v811_v49 = vld [vmem:[%s1987_s19 + $0x128] sm:$0xff] }
  0xb3   : > { %v867_v20 = vpop.permute.xlu0 %866 }
  0xb4   : > { %1059 = vst [vmem:[%s2006_s22 + $0x70] sm:$0xff] %v998_v51  ;;  %v996_v15 = vmul.f32 %v867_v20, %v786_v21  ;;  %v997_v14 = vmul.f32 %v867_v20, %v787_v53  ;;  %v818_v53 = vld [vmem:[%s1987_s19 + $0x160] sm:$0xff]  ;;  %v819_v20 = vld [vmem:[%s1987_s19 + $0x168] sm:$0xff] }
  0xb5   : > { %1060 = vst.msk [vmem:[%s2006_s22 + $0x78] sm:$0xff] %vm1045_vm8, %v999_v50 }
  0xb6   : > { %1057 = vst [vmem:[%s2006_s22 + $0x60] sm:$0xff] %v996_v15 }
  0xb7   : > { %v922_v23 = vpop.permute.xlu2 %921  ;;  %1058 = vst.msk [vmem:[%s2006_s22 + $0x68] sm:$0xff] %vm1045_vm8, %v997_v14 }
  0xb8   : > { %v1018_v24 = vmul.f32 %v922_v23, %v808_v22  ;;  %v1019_v25 = vmul.f32 %v922_v23, %v809_v18  ;;  %v832_v22 = vld [vmem:[%s1987_s19 + $0x1d0] sm:$0xff]  ;;  %v833_v18 = vld [vmem:[%s1987_s19 + $0x1d8] sm:$0xff] }
  0xba   : > { %1079 = vst [vmem:[%s2006_s22 + $0x110] sm:$0xff] %v1018_v24 }
  0xbb   : > { %1080 = vst.msk [vmem:[%s2006_s22 + $0x118] sm:$0xff] %vm1045_vm8, %v1019_v25  ;;  %v816_v25 = vld [vmem:[%s1987_s19 + $0x150] sm:$0xff] }
  0xc1   : > { %v887_v31 = vpop.permute.xlu1 %886 }
  0xc2   : > { %v1004_v32 = vmul.f32 %v887_v31, %v794_v27  ;;  %v1005_v33 = vmul.f32 %v887_v31, %v795_v28  ;;  %v882_v37 = vpop.permute.xlu0 %881  ;;  %v817_v27 = vld [vmem:[%s1987_s19 + $0x158] sm:$0xff] }
  0xc3   : > { %v1002_v38 = vmul.f32 %v882_v37, %v792_v19  ;;  %v1003_v26 = vmul.f32 %v882_v37, %v793_v30  ;;  %v825_v37 = vld [vmem:[%s1987_s19 + $0x198] sm:$0xff] }
  0xc4   : > { %1065 = vst [vmem:[%s2006_s22 + $0xa0] sm:$0xff] %v1004_v32 }
  0xc5   : > { %1066 = vst.msk [vmem:[%s2006_s22 + $0xa8] sm:$0xff] %vm1045_vm8, %v1005_v33  ;;  %v824_v33 = vld [vmem:[%s1987_s19 + $0x190] sm:$0xff] }
  0xc6   : > { %1063 = vst [vmem:[%s2006_s22 + $0x90] sm:$0xff] %v1002_v38 }
  0xc7   : > { %1064 = vst.msk [vmem:[%s2006_s22 + $0x98] sm:$0xff] %vm1045_vm8, %v1003_v26 }
  0xc9   : > { %v937_v41 = vpop.permute.xlu2 %936  ;;  %v902_v44 = vpop.permute.xlu1 %901 }
  0xca   : > { %v1024_v46 = vmul.f32 %v937_v41, %v814_v39  ;;  %v1025_v48 = vmul.f32 %v937_v41, %v815_v40  ;;  %v1010_v29 = vmul.f32 %v902_v44, %v800_v34  ;;  %v1011_v42 = vmul.f32 %v902_v44, %v801_v43  ;;  %v822_v40 = vld [vmem:[%s1987_s19 + $0x180] sm:$0xff]  ;;  %v823_v34 = vld [vmem:[%s1987_s19 + $0x188] sm:$0xff] }
  0xcb   : > { %v897_v47 = vpop.permute.xlu0 %896 }
  0xcc   : > { %1085 = vst [vmem:[%s2006_s22 + $0x140] sm:$0xff] %v1024_v46  ;;  %v1008_v54 = vmul.f32 %v897_v47, %v798_v45  ;;  %v1009_v55 = vmul.f32 %v897_v47, %v799_v52  ;;  %v830_v45 = vld [vmem:[%s1987_s19 + $0x1c0] sm:$0xff]  ;;  %v831_v46 = vld [vmem:[%s1987_s19 + $0x1c8] sm:$0xff]  ;;  %v829_v47 = vld [vmem:[%s1987_s19 + $0x1b8] sm:$0xff] }
  0xcd   : > { %1086 = vst.msk [vmem:[%s2006_s22 + $0x148] sm:$0xff] %vm1045_vm8, %v1025_v48 }
  0xce   : > { %1071 = vst [vmem:[%s2006_s22 + $0xd0] sm:$0xff] %v1010_v29 }
  0xcf   : > { %1072 = vst.msk [vmem:[%s2006_s22 + $0xd8] sm:$0xff] %vm1045_vm8, %v1011_v42  ;;  %v828_v42 = vld [vmem:[%s1987_s19 + $0x1b0] sm:$0xff] }
  0xd0   : > { %1069 = vst [vmem:[%s2006_s22 + $0xc0] sm:$0xff] %v1008_v54 }
  0xd1   : > { %v952_v58 = vpop.permute.xlu2 %951  ;;  %1070 = vst.msk [vmem:[%s2006_s22 + $0xc8] sm:$0xff] %vm1045_vm8, %v1009_v55 }
  0xd2   : > { %v1030_v59 = vmul.f32 %v952_v58, %v820_v56  ;;  %v1031_v60 = vmul.f32 %v952_v58, %v821_v57 }
  0xd4   : > { %1091 = vst [vmem:[%s2006_s22 + $0x170] sm:$0xff] %v1030_v59 }
  0xd5   : > { %1092 = vst.msk [vmem:[%s2006_s22 + $0x178] sm:$0xff] %vm1045_vm8, %v1031_v60 }
  0xd7   : > { %v917_v63 = vpop.permute.xlu1 %916 }
  0xd8   : > { %v1016_v35 = vmul.f32 %v917_v63, %v806_v61  ;;  %v1017_v0 = vmul.f32 %v917_v63, %v807_v62 }
  0xda   : > { %1077 = vst [vmem:[%s2006_s22 + $0x100] sm:$0xff] %v1016_v35 }
  0xdb   : > { %1078 = vst.msk [vmem:[%s2006_s22 + $0x108] sm:$0xff] %vm1045_vm8, %v1017_v0 }
  0xdc   : > { %v967_v36 = vpop.permute.xlu2 %966 }
  0xdd   : > { %v1036_v7 = vmul.f32 %v967_v36, %v826_v3  ;;  %v1037_v8 = vmul.f32 %v967_v36, %v827_v4 }
  0xde   : > { %v912_v1 = vpop.permute.xlu0 %911 }
  0xdf   : > { %v1014_v9 = vmul.f32 %v912_v1, %v804_v5  ;;  %v1015_v10 = vmul.f32 %v912_v1, %v805_v6  ;;  %1097 = vst [vmem:[%s2006_s22 + $0x1a0] sm:$0xff] %v1036_v7 }
  0xe0   : > { %1098 = vst.msk [vmem:[%s2006_s22 + $0x1a8] sm:$0xff] %vm1045_vm8, %v1037_v8 }
  0xe1   : > { %1075 = vst [vmem:[%s2006_s22 + $0xf0] sm:$0xff] %v1014_v9 }
  0xe2   : > { %1076 = vst.msk [vmem:[%s2006_s22 + $0xf8] sm:$0xff] %vm1045_vm8, %v1015_v10  ;;  %v932_v13 = vpop.permute.xlu1 %931 }
  0xe3   : > { %v1022_v2 = vmul.f32 %v932_v13, %v812_v11  ;;  %v1023_v16 = vmul.f32 %v932_v13, %v813_v12 }
  0xe5   : > { %1083 = vst [vmem:[%s2006_s22 + $0x130] sm:$0xff] %v1022_v2 }
  0xe6   : > { %v927_v51 = vpop.permute.xlu0 %926  ;;  %1084 = vst.msk [vmem:[%s2006_s22 + $0x138] sm:$0xff] %vm1045_vm8, %v1023_v16 }
  0xe7   : > { %v1020_v50 = vmul.f32 %v927_v51, %v810_v17  ;;  %v1021_v21 = vmul.f32 %v927_v51, %v811_v49 }
  0xe9   : > { %1081 = vst [vmem:[%s2006_s22 + $0x120] sm:$0xff] %v1020_v50 }
  0xea   : > { %1082 = vst.msk [vmem:[%s2006_s22 + $0x128] sm:$0xff] %vm1045_vm8, %v1021_v21  ;;  %v947_v15 = vpop.permute.xlu1 %946 }
  0xeb   : > { %v1028_v14 = vmul.f32 %v947_v15, %v818_v53  ;;  %v1029_v23 = vmul.f32 %v947_v15, %v819_v20 }
  0xec   : > { %v982_v24 = vpop.permute.xlu2 %981 }
  0xed   : > { %v1042_v28 = vmul.f32 %v982_v24, %v832_v22  ;;  %v1043_v19 = vmul.f32 %v982_v24, %v833_v18  ;;  %1089 = vst [vmem:[%s2006_s22 + $0x160] sm:$0xff] %v1028_v14 }
  0xee   : > { %1090 = vst.msk [vmem:[%s2006_s22 + $0x168] sm:$0xff] %vm1045_vm8, %v1029_v23  ;;  %v942_v30 = vpop.permute.xlu0 %941 }
  0xef   : > { %1103 = vst [vmem:[%s2006_s22 + $0x1d0] sm:$0xff] %v1042_v28  ;;  %v1026_v31 = vmul.f32 %v942_v30, %v816_v25  ;;  %v1027_v32 = vmul.f32 %v942_v30, %v817_v27 }
  0xf0   : > { %1104 = vst.msk [vmem:[%s2006_s22 + $0x1d8] sm:$0xff] %vm1045_vm8, %v1043_v19 }
  0xf1   : > { %1087 = vst [vmem:[%s2006_s22 + $0x150] sm:$0xff] %v1026_v31 }
  0xf2   : > { %1088 = vst.msk [vmem:[%s2006_s22 + $0x158] sm:$0xff] %vm1045_vm8, %v1027_v32 }
  0xf7   : > { %v962_v38 = vpop.permute.xlu1 %961 }
  0xf8   : > { %v1034_v26 = vmul.f32 %v962_v38, %v824_v33  ;;  %v1035_v39 = vmul.f32 %v962_v38, %v825_v37 }
  0xfa   : > { %1095 = vst [vmem:[%s2006_s22 + $0x190] sm:$0xff] %v1034_v26 }
  0xfb   : > { %1096 = vst.msk [vmem:[%s2006_s22 + $0x198] sm:$0xff] %vm1045_vm8, %v1035_v39 }
 0x101   : > { %v957_v43 = vpop.permute.xlu0 %956 }
 0x102   : > { %v1032_v41 = vmul.f32 %v957_v43, %v822_v40  ;;  %v1033_v44 = vmul.f32 %v957_v43, %v823_v34 }
 0x104   : > { %1093 = vst [vmem:[%s2006_s22 + $0x180] sm:$0xff] %v1032_v41 }
 0x105   : > { %1094 = vst.msk [vmem:[%s2006_s22 + $0x188] sm:$0xff] %vm1045_vm8, %v1033_v44  ;;  %v977_v48 = vpop.permute.xlu1 %976 }
 0x106   : > { %v1040_v29 = vmul.f32 %v977_v48, %v830_v45  ;;  %v1041_v52 = vmul.f32 %v977_v48, %v831_v46 }
 0x108   : > { %1101 = vst [vmem:[%s2006_s22 + $0x1c0] sm:$0xff] %v1040_v29 }
 0x109   : > { %1102 = vst.msk [vmem:[%s2006_s22 + $0x1c8] sm:$0xff] %vm1045_vm8, %v1041_v52  ;;  %v972_v54 = vpop.permute.xlu0 %971 }
 0x10a   : > { %v1038_v55 = vmul.f32 %v972_v54, %v828_v42  ;;  %v1039_v56 = vmul.f32 %v972_v54, %v829_v47 }
 0x10c   : > { %1099 = vst [vmem:[%s2006_s22 + $0x1b0] sm:$0xff] %v1038_v55 }
 0x10d   : > { %1100 = vst.msk [vmem:[%s2006_s22 + $0x1b8] sm:$0xff] %vm1045_vm8, %v1039_v56 }
 0x10e PF: > { %s12_s9 = sadd.s32 1, %s1357_s9  }
 0x10f   : > { %p9_p4 = scmp.ge.s32.totalorder %s12_s9, 6  }
 0x111   :  { %11 = sbr.rel (!%p9_p4) target bundleno = 1 (0x1), region = 61 }

</bundles_post_ra>
